<compile_context>
chip_gen: v5e
topology: v5e:2x2
jax: 0.10.0
libtpu: 0.0.40
codegen_flags: <defaults>
</compile_context>

<pallas_src>
import jax
import jax.numpy as jnp
from jax import lax
from jax.experimental import pallas as pl
from jax.experimental.pallas import tpu as pltpu

HIDDEN = 128   # hidden_size  (lane-dense: multiple of 128)
VOCAB = 128    # input_size (must equal hidden_size, see note above)
OUTPUT = 128   # output_size
N_LAYERS = 1
BATCH = 1
SEQ = 16       # number of characters processed per kernel call


def _char_rnn_seq_kernel(idx_ref,          # SMEM [T]  int32 character indices
                         gate_tab_ref,     # VMEM [VOCAB, 4H]  emb@w_ih.T + b_ih + b_hh
                         w_hh_ref,         # VMEM [H, 4H]      (pre-transposed)
                         h0_ref, c0_ref,   # VMEM [1, H]
                         w_dec_ref,        # VMEM [H, O]       (pre-transposed)
                         b_dec_ref,        # VMEM [1, O]
                         logits_ref,       # VMEM [T, O]
                         h_ref, c_ref):    # VMEM [1, H]  final state (also the loop carry)
    H = h0_ref.shape[-1]
    T = logits_ref.shape[0]

    # (h, c) carries live in the output refs -> VMEM-resident across all steps.
    h_ref[...] = h0_ref[...]
    c_ref[...] = c0_ref[...]

    def step(t, carry):
        idx = idx_ref[t]
        # Input-side gate contribution: one row of the precomputed table. [1, 4H]
        x_gates = gate_tab_ref[pl.ds(idx, 1), :]
        gates = x_gates + jnp.dot(h_ref[...], w_hh_ref[...],
                                  preferred_element_type=jnp.float32)
        # PyTorch LSTM gate order: i, f, g, o  (each slice = full 128-lane vreg)
        i = jax.nn.sigmoid(gates[:, 0 * H:1 * H])
        f = jax.nn.sigmoid(gates[:, 1 * H:2 * H])
        g = jnp.tanh(gates[:, 2 * H:3 * H])
        o = jax.nn.sigmoid(gates[:, 3 * H:4 * H])
        c_new = f * c_ref[...] + i * g
        h_new = o * jnp.tanh(c_new)

        # Decoder: Linear(hidden, output_size)
        logits_ref[pl.ds(t, 1), :] = (
            jnp.dot(h_new, w_dec_ref[...], preferred_element_type=jnp.float32)
            + b_dec_ref[...])

        h_ref[...] = h_new
        c_ref[...] = c_new
        return carry

    lax.fori_loop(0, T, step, 0)


def prepare_params(params):
    """One-time weight prep (fold embedding+input matmul, pre-transpose)."""
    gate_tab = (params["emb"] @ params["w_ih"].T
                + params["b_ih"][None, :] + params["b_hh"][None, :])
    return {
        "gate_tab": gate_tab.astype(jnp.float32),             # [VOCAB, 4H]
        "w_hh_t": params["w_hh"].T.astype(jnp.float32),        # [H, 4H]
        "w_dec_t": params["w_dec"].T.astype(jnp.float32),      # [H, O]
        "b_dec_2d": params["b_dec"].reshape(1, -1).astype(jnp.float32),  # [1, O]
    }


def rnn_forward(x_idx, hidden, prep):
    """x_idx: int32 [T]; hidden: (h0, c0) each [1, 1, H] (torch layout)."""
    h0, c0 = hidden
    H = prep["w_hh_t"].shape[0]
    O = prep["w_dec_t"].shape[1]
    T = x_idx.shape[0]

    idx = x_idx.reshape(T).astype(jnp.int32)
    h0_2d = h0.reshape(1, H).astype(jnp.float32)
    c0_2d = c0.reshape(1, H).astype(jnp.float32)

    vmem = pl.BlockSpec(memory_space=pltpu.MemorySpace.VMEM)
    smem = pl.BlockSpec(memory_space=pltpu.MemorySpace.SMEM)

    logits, h_new, c_new = pl.pallas_call(
        _char_rnn_seq_kernel,
        out_shape=(
            jax.ShapeDtypeStruct((T, O), jnp.float32),
            jax.ShapeDtypeStruct((1, H), jnp.float32),
            jax.ShapeDtypeStruct((1, H), jnp.float32),
        ),
        in_specs=[smem] + [vmem] * 6,
        out_specs=(vmem, vmem, vmem),
    )(idx,
      prep["gate_tab"], prep["w_hh_t"],
      h0_2d, c0_2d,
      prep["w_dec_t"], prep["b_dec_2d"])

    return logits, (h_new.reshape(1, 1, H), c_new.reshape(1, 1, H))


def ref_forward(x_idx, hidden, params):
    """Pure-JAX reference: the torch forward applied per character."""
    h0, c0 = hidden
    H = params["emb"].shape[1]
    h = h0.reshape(1, H)
    c = c0.reshape(1, H)
    outs = []
    for t in range(x_idx.shape[0]):
        x = params["emb"][x_idx[t]][None, :]                      # [1, H]
        gates = (x @ params["w_ih"].T + h @ params["w_hh"].T
                 + params["b_ih"] + params["b_hh"])
        i = jax.nn.sigmoid(gates[:, 0 * H:1 * H])
        f = jax.nn.sigmoid(gates[:, 1 * H:2 * H])
        g = jnp.tanh(gates[:, 2 * H:3 * H])
        o = jax.nn.sigmoid(gates[:, 3 * H:4 * H])
        c = f * c + i * g
        h = o * jnp.tanh(c)
        outs.append(h @ params["w_dec"].T + params["b_dec"])
    return jnp.concatenate(outs, 0), (h.reshape(1, 1, H), c.reshape(1, 1, H))


def init_params(key, vocab, hidden, output):
    ks = jax.random.split(key, 7)
    k_lstm = 1.0 / jnp.sqrt(hidden)
    k_dec = 1.0 / jnp.sqrt(hidden)
    return {
        # nn.Embedding default init: N(0, 1)
        "emb": jax.random.normal(ks[0], (vocab, hidden), jnp.float32),
        # nn.LSTM default init: U(-1/sqrt(H), 1/sqrt(H)); gate order i,f,g,o
        "w_ih": jax.random.uniform(ks[1], (4 * hidden, vocab), jnp.float32,
                                   -k_lstm, k_lstm),
        "w_hh": jax.random.uniform(ks[2], (4 * hidden, hidden), jnp.float32,
                                   -k_lstm, k_lstm),
        "b_ih": jax.random.uniform(ks[3], (4 * hidden,), jnp.float32,
                                   -k_lstm, k_lstm),
        "b_hh": jax.random.uniform(ks[4], (4 * hidden,), jnp.float32,
                                   -k_lstm, k_lstm),
        # nn.Linear default init: U(-1/sqrt(in), 1/sqrt(in))
        "w_dec": jax.random.uniform(ks[5], (output, hidden), jnp.float32,
                                    -k_dec, k_dec),
        "b_dec": jax.random.uniform(ks[6], (output,), jnp.float32,
                                    -k_dec, k_dec),
    }


if __name__ == "__main__":
    key = jax.random.PRNGKey(0)
    k_par, k_x = jax.random.split(key)
    params = init_params(k_par, VOCAB, HIDDEN, OUTPUT)
    prep = prepare_params(params)   # one-time fold/transpose (not per call)

    # a short character-index sequence, and the zero (h, c) from init_hidden()
    x = jax.random.randint(k_x, (SEQ,), 0, VOCAB, dtype=jnp.int32)
    h0 = jnp.zeros((N_LAYERS, BATCH, HIDDEN), jnp.float32)
    c0 = jnp.zeros((N_LAYERS, BATCH, HIDDEN), jnp.float32)

    logits, (h, c) = rnn_forward(x, (h0, c0), prep)
    jax.block_until_ready((logits, h, c))

    logits_r, (h_r, c_r) = ref_forward(x, (h0, c0), params)
    assert logits.shape == (SEQ, OUTPUT) and h.shape == (1, 1, HIDDEN) \
        and c.shape == (1, 1, HIDDEN)
    assert jnp.allclose(logits, logits_r, atol=1e-4, rtol=1e-4)
    assert jnp.allclose(h, h_r, atol=1e-4, rtol=1e-4)
    assert jnp.allclose(c, c_r, atol=1e-4, rtol=1e-4)

    print("KERNEL_OK")
</pallas_src>

<mosaic_0001>
module attributes {stable_mosaic.version = 11 : i64} {
  func.func @_char_rnn_seq_kernel(%arg0: memref<16xi32, #tpu.memory_space<smem>>, %arg1: memref<128x512xf32, #tpu.memory_space<vmem>>, %arg2: memref<128x512xf32, #tpu.memory_space<vmem>>, %arg3: memref<1x128xf32, #tpu.memory_space<vmem>>, %arg4: memref<1x128xf32, #tpu.memory_space<vmem>>, %arg5: memref<128x128xf32, #tpu.memory_space<vmem>>, %arg6: memref<1x128xf32, #tpu.memory_space<vmem>>, %arg7: memref<16x128xf32, #tpu.memory_space<vmem>>, %arg8: memref<1x128xf32, #tpu.memory_space<vmem>>, %arg9: memref<1x128xf32, #tpu.memory_space<vmem>>) attributes {dimension_semantics = [], scalar_prefetch = 0 : i64, scratch_operands = 0 : i64, tpu.core_type = #tpu.core_type<tc>} {
    %c0 = arith.constant 0 : index
    %c0_0 = arith.constant 0 : index
    %0 = vector.load %arg3[%c0, %c0_0] : memref<1x128xf32, #tpu.memory_space<vmem>>, vector<1x128xf32>
    %c0_1 = arith.constant 0 : index
    %c0_2 = arith.constant 0 : index
    %1 = vector.load %arg8[%c0_1, %c0_2] : memref<1x128xf32, #tpu.memory_space<vmem>>, vector<1x128xf32>
    tpu.vector_store %arg8[%c0_1, %c0_2], %0 {strides = array<i32>} : memref<1x128xf32, #tpu.memory_space<vmem>>, vector<1x128xf32>,
    %c0_3 = arith.constant 0 : index
    %c0_4 = arith.constant 0 : index
    %2 = vector.load %arg4[%c0_3, %c0_4] : memref<1x128xf32, #tpu.memory_space<vmem>>, vector<1x128xf32>
    %c0_5 = arith.constant 0 : index
    %c0_6 = arith.constant 0 : index
    %3 = vector.load %arg9[%c0_5, %c0_6] : memref<1x128xf32, #tpu.memory_space<vmem>>, vector<1x128xf32>
    tpu.vector_store %arg9[%c0_5, %c0_6], %2 {strides = array<i32>} : memref<1x128xf32, #tpu.memory_space<vmem>>, vector<1x128xf32>,
    %c0_i32 = arith.constant 0 : i32
    %c16_i32 = arith.constant 16 : i32
    %4 = arith.addi %c0_i32, %c16_i32 : i32
    %c1_i32 = arith.constant 1 : i32
    scf.for %arg10 = %c0_i32 to %4 step %c1_i32  : i32 {
      %5 = arith.index_cast %arg10 : i32 to index
      %6 = memref.load %arg0[%5] : memref<16xi32, #tpu.memory_space<smem>>
      %7 = arith.index_cast %6 : i32 to index
      %c0_8 = arith.constant 0 : index
      %8 = vector.load %arg1[%7, %c0_8] : memref<128x512xf32, #tpu.memory_space<vmem>>, vector<1x512xf32>
      %c0_9 = arith.constant 0 : index
      %c0_10 = arith.constant 0 : index
      %9 = vector.load %arg8[%c0_9, %c0_10] : memref<1x128xf32, #tpu.memory_space<vmem>>, vector<1x128xf32>
      %c0_11 = arith.constant 0 : index
      %c0_12 = arith.constant 0 : index
      %10 = vector.load %arg2[%c0_11, %c0_12] : memref<128x512xf32, #tpu.memory_space<vmem>>, vector<128x512xf32>
      %cst = arith.constant dense<0.000000e+00> : vector<1x512xf32>
      %11 = tpu.matmul %9, %10, %cst {dimension_numbers = #tpu.dot_dimension_numbers<[1], [0], [0], [1], [0, 0, 1, 1], [], []>} : vector<1x128xf32>, vector<128x512xf32>, vector<1x512xf32> -> vector<1x512xf32>
      %12 = arith.addf %8, %11 : vector<1x512xf32>
      %13 = vector.extract_strided_slice %12 {offsets = [0, 0], sizes = [1, 128], strides = [1, 1]} : vector<1x512xf32> to vector<1x128xf32>
      %14 = arith.negf %13 : vector<1x128xf32>
      %15 = math.exp %14 : vector<1x128xf32>
      %cst_13 = arith.constant 1.000000e+00 : f32
      %16 = vector.broadcast %cst_13 : f32 to vector<1x128xf32>
      %17 = arith.addf %16, %15 : vector<1x128xf32>
      %18 = arith.divf %16, %17 : vector<1x128xf32>
      %19 = vector.extract_strided_slice %12 {offsets = [0, 128], sizes = [1, 128], strides = [1, 1]} : vector<1x512xf32> to vector<1x128xf32>
      %20 = arith.negf %19 : vector<1x128xf32>
      %21 = math.exp %20 : vector<1x128xf32>
      %cst_14 = arith.constant 1.000000e+00 : f32
      %22 = vector.broadcast %cst_14 : f32 to vector<1x128xf32>
      %23 = arith.addf %22, %21 : vector<1x128xf32>
      %24 = arith.divf %22, %23 : vector<1x128xf32>
      %25 = vector.extract_strided_slice %12 {offsets = [0, 256], sizes = [1, 128], strides = [1, 1]} : vector<1x512xf32> to vector<1x128xf32>
      %26 = math.tanh %25 : vector<1x128xf32>
      %27 = vector.extract_strided_slice %12 {offsets = [0, 384], sizes = [1, 128], strides = [1, 1]} : vector<1x512xf32> to vector<1x128xf32>
      %28 = arith.negf %27 : vector<1x128xf32>
      %29 = math.exp %28 : vector<1x128xf32>
      %cst_15 = arith.constant 1.000000e+00 : f32
      %30 = vector.broadcast %cst_15 : f32 to vector<1x128xf32>
      %31 = arith.addf %30, %29 : vector<1x128xf32>
      %32 = arith.divf %30, %31 : vector<1x128xf32>
      %c0_16 = arith.constant 0 : index
      %c0_17 = arith.constant 0 : index
      %33 = vector.load %arg9[%c0_16, %c0_17] : memref<1x128xf32, #tpu.memory_space<vmem>>, vector<1x128xf32>
      %34 = arith.mulf %24, %33 : vector<1x128xf32>
      %35 = arith.mulf %18, %26 : vector<1x128xf32>
      %36 = arith.addf %34, %35 : vector<1x128xf32>
      %37 = math.tanh %36 : vector<1x128xf32>
      %38 = arith.mulf %32, %37 : vector<1x128xf32>
      %c0_18 = arith.constant 0 : index
      %c0_19 = arith.constant 0 : index
      %39 = vector.load %arg5[%c0_18, %c0_19] : memref<128x128xf32, #tpu.memory_space<vmem>>, vector<128x128xf32>
      %cst_20 = arith.constant dense<0.000000e+00> : vector<1x128xf32>
      %40 = tpu.matmul %38, %39, %cst_20 {dimension_numbers = #tpu.dot_dimension_numbers<[1], [0], [0], [1], [0, 0, 1, 1], [], []>} : vector<1x128xf32>, vector<128x128xf32>, vector<1x128xf32> -> vector<1x128xf32>
      %c0_21 = arith.constant 0 : index
      %c0_22 = arith.constant 0 : index
      %41 = vector.load %arg6[%c0_21, %c0_22] : memref<1x128xf32, #tpu.memory_space<vmem>>, vector<1x128xf32>
      %42 = arith.addf %40, %41 : vector<1x128xf32>
      %43 = arith.index_cast %arg10 : i32 to index
      %c0_23 = arith.constant 0 : index
      %44 = vector.load %arg7[%43, %c0_23] : memref<16x128xf32, #tpu.memory_space<vmem>>, vector<1x128xf32>
      tpu.vector_store %arg7[%43, %c0_23], %42 {strides = array<i32>} : memref<16x128xf32, #tpu.memory_space<vmem>>, vector<1x128xf32>,
      %c0_24 = arith.constant 0 : index
      %c0_25 = arith.constant 0 : index
      %45 = vector.load %arg8[%c0_24, %c0_25] : memref<1x128xf32, #tpu.memory_space<vmem>>, vector<1x128xf32>
      tpu.vector_store %arg8[%c0_24, %c0_25], %38 {strides = array<i32>} : memref<1x128xf32, #tpu.memory_space<vmem>>, vector<1x128xf32>,
      %c0_26 = arith.constant 0 : index
      %c0_27 = arith.constant 0 : index
      %46 = vector.load %arg9[%c0_26, %c0_27] : memref<1x128xf32, #tpu.memory_space<vmem>>, vector<1x128xf32>
      tpu.vector_store %arg9[%c0_26, %c0_27], %36 {strides = array<i32>} : memref<1x128xf32, #tpu.memory_space<vmem>>, vector<1x128xf32>,
    }
    %c16_i32_7 = arith.constant 16 : i32
    return
  }
}

</mosaic_0001>

<bundles_post_ra>
// kernel: tpu_custom_call.1
= control target key start
LH: loop header
LB: loop body
LE: loop exit
PB: predicated region body
PF: predicated region fallthrough
CT: control target
= control target key end

     0   :  { %15 = vsyncpa [#allocation5], 0  ;;  %s766_s0 = inlined_call_operand.hbm [shape: s32[16], index: 0, kind: input, shape index: {}]   ;;  %s767_s1 = inlined_call_operand.hbm [shape: f32[128,512], index: 1, kind: input, shape index: {}]   ;;  %s768_s2 = inlined_call_operand.hbm [shape: f32[128,512], index: 2, kind: input, shape index: {}]   ;;  %s769_s3 = inlined_call_operand.vmem [shape: f32[1,128], index: 3, kind: input, shape index: {}]   ;;  %s770_s4 = inlined_call_operand.vmem [shape: f32[1,128], index: 4, kind: input, shape index: {}]   ;;  %s771_s5 = inlined_call_operand.hbm [shape: f32[128,128], index: 5, kind: input, shape index: {}]   ;;  %s772_s6 = inlined_call_operand.vmem [shape: f32[1,128], index: 6, kind: input, shape index: {}]   ;;  %s773_s7 = inlined_call_operand.hbm [shape: f32[16,128], index: 7, kind: output, shape index: {0}]   ;;  %s774_s8 = inlined_call_operand.hbm [shape: f32[1,128], index: 8, kind: output, shape index: {1}]   ;;  %s775_s9 = inlined_call_operand.hbm [shape: f32[1,128], index: 9, kind: output, shape index: {2}]  }
   0x1   :  { %16 = vsyncpa [#allocation3], 0 }
   0x2   :  { %17 = vsyncpa [#allocation8], 0 }
   0x3   :  { %18 = vsyncpa [#allocation4], 0 }
   0x4   :  { %19 = vsyncpa [#allocation12], 0  ;;  %s46_s11 = sshll.u32 %s768_s2, 4  ;;  %s659_s12 = smov [#allocation7]   ;;  %s47_s11 = int_to_ptr.hbm [resolvable:$true] %s46_s11 }
   0x5   :  { %s48_s13 = sshll.u32 %s659_s12, 4  ;;  %s25_s16 = sshll.u32 %s766_s0, 4  ;;  %s49_s13 = int_to_ptr.vmem [resolvable:$true] %s48_s13  ;;  %s26_s16 = int_to_ptr.hbm [resolvable:$true] %s25_s16 }
   0x6   :  { %s660_s17 = smov 512   ;;  %s661_s18 = smov 32  }
   0x7   :  { %54 = dma.hbm_to_vmem [thread:$0]  %s47_s11, 8192, %s49_s13, [#allocation8], %s660_s17, %s660_s17, %s661_s18  }
   0x8   :  { %s662_s19 = smov [#allocation2]   ;;  %s33_s22 = sshll.u32 %s767_s1, 4  ;;  %s34_s22 = int_to_ptr.hbm [resolvable:$true] %s33_s22 }
   0x9   :  { %28 = dma.hbm_to_smem %s26_s16, 16, %s662_s19, [#allocation5]  }
   0xa   :  { %s663_s2 = smov [#allocation6]   ;;  %s63_s26 = sshll.u32 %s771_s5, 4  ;;  %s64_s26 = int_to_ptr.hbm [resolvable:$true] %s63_s26 }
   0xb   :  { %s35_s23 = sshll.u32 %s663_s2, 4  ;;  %s664_s0 = smov [#allocation9]   ;;  %s36_s23 = int_to_ptr.vmem [resolvable:$true] %s35_s23 }
   0xc   :  { %41 = dma.hbm_to_vmem [thread:$0]  %s34_s22, 8192, %s36_s23, [#allocation3], %s660_s17, %s660_s17, %s661_s18  }
   0xd   :  { %s65_s27 = sshll.u32 %s664_s0, 4  ;;  %s665_s28 = smov 128   ;;  %s66_s27 = int_to_ptr.vmem [resolvable:$true] %s65_s27 }
   0xe   :  { %s666_s29 = smov 8  }
   0xf   :  { %71 = dma.hbm_to_vmem [thread:$0]  %s64_s26, 2048, %s66_s27, [#allocation8], %s665_s28, %s665_s28, %s666_s29  }
  0x10   :  { %645 = dma.done.wait [#allocation5], 16  }
  0x11   :  { %646 = vsyncadd [#allocation5], 4294967280 }
  0x12   :  { %647 = dma.done.wait [#allocation3], 8192  }
  0x13   :  { %648 = vsyncadd [#allocation3], 4294959104 }
  0x14   :  { %649 = dma.done.wait [#allocation8], 10240  }
  0x15   :  { %650 = vsyncadd [#allocation8], 4294957056 }
  0x16   :  { %90 = sfence }
  0x17   :  { %v91_v0 = vld [vmem:[%s769_s3] sm:$0x1]  ;;  %s741_s11 = smov 0  }
  0x18   :  { %v93_v1 = vld [vmem:[%s770_s4] sm:$0x1]  ;;  %92 = vst [vmem:[#allocation11] sm:$0x1] %v91_v0 }
  0x19   :  { %94 = vst [vmem:[#allocation13] sm:$0x1] %v93_v1 }
  0x1a LB: > { %v174_v2 = vld [vmem:[#allocation7 + $0x1f0] sm:$0xff]  ;;  %v175_v3 = vld [vmem:[#allocation7 + $0x1f8] sm:$0xff]  ;;  %v173_v8 = vld [vmem:[#allocation7 + $0x1e8] sm:$0xff]  ;;  %s101_s3 = sld [smem:[#allocation2 + %s657_s11]]  ;;  %vm263_vm0 = vcmask 1040384   ;;  %vm265_vm1 = vcmask 1042434   ;;  %s657_s11 = sphi %s741_s11, %s100_s11  }
  0x1b   : > { %v170_v4 = vld [vmem:[#allocation7 + $0x1d0] sm:$0xff]  ;;  %216 = vmatpush.msra.mxu2 %v174_v2  ;;  %236 = vmatpush.msra.mxu3 %v175_v3  ;;  %v171_v5 = vld [vmem:[#allocation7 + $0x1d8] sm:$0xff]  ;;  %v172_v9 = vld [vmem:[#allocation7 + $0x1e0] sm:$0xff]  ;;  %vm267_vm2 = vcmask 1041408   ;;  %s379_s18 = scalar_lea.vmem [#allocation10], %s657_s11  ;;  %s100_s11 = sadd.s32 1, %s657_s11  }
  0x1c   : > { %v166_v6 = vld [vmem:[#allocation7 + $0x1b0] sm:$0xff]  ;;  %v167_v7 = vld [vmem:[#allocation7 + $0x1b8] sm:$0xff]  ;;  %v169_v10 = vld [vmem:[#allocation7 + $0x1c8] sm:$0xff]  ;;  %196 = vmatpush.msra.mxu1 %v173_v8  ;;  %176 = vmatpush.msra.mxu0 %v172_v9  ;;  %p97_p0 = scmp.ge.s32.totalorder %s100_s11, 16  }
  0x1d   : > { %217 = vmatpush.msra.mxu2 %v170_v4  ;;  %237 = vmatpush.msra.mxu3 %v171_v5  ;;  %v162_v11 = vld [vmem:[#allocation7 + $0x190] sm:$0xff]  ;;  %v163_v12 = vld [vmem:[#allocation7 + $0x198] sm:$0xff]  ;;  %v168_v13 = vld [vmem:[#allocation7 + $0x1c0] sm:$0xff]  ;;  %s403_s21 = sshll.u32 (%p97_p0), %s774_s8, 4  ;;  %s667_s22 = smov (%p97_p0), [#allocation11]   ;;  %s404_s21 = int_to_ptr.hbm [resolvable:$true] %s403_s21 }
  0x1e   : > { %v165_v14 = vld [vmem:[#allocation7 + $0x1a8] sm:$0xff]  ;;  %v164_v15 = vld [vmem:[#allocation7 + $0x1a0] sm:$0xff]  ;;  %197 = vmatpush.msra.mxu1 %v169_v10  ;;  %v158_v16 = vld [vmem:[#allocation7 + $0x170] sm:$0xff]  ;;  %177 = vmatpush.msra.mxu0 %v168_v13  ;;  %s401_s2 = sshll.u32 (%p97_p0), %s667_s22, 4  ;;  %s668_s23 = smov (%p97_p0), [#allocation10]   ;;  %s402_s2 = int_to_ptr.vmem [resolvable:$true] %s401_s2 }
  0x1f   : > { %218 = vmatpush.msra.mxu2 %v166_v6  ;;  %238 = vmatpush.msra.mxu3 %v167_v7  ;;  %v159_v17 = vld [vmem:[#allocation7 + $0x178] sm:$0xff]  ;;  %v161_v18 = vld [vmem:[#allocation7 + $0x188] sm:$0xff]  ;;  %v160_v19 = vld [vmem:[#allocation7 + $0x180] sm:$0xff]  ;;  %s387_s24 = sshll.u32 (%p97_p0), %s668_s23, 4  ;;  %s389_s0 = sshll.u32 (%p97_p0), %s773_s7, 4  ;;  %s388_s24 = int_to_ptr.vmem [resolvable:$true] %s387_s24  ;;  %s390_s0 = int_to_ptr.hbm [resolvable:$true] %s389_s0 }
  0x20   : > { %198 = vmatpush.msra.mxu1 %v165_v14  ;;  %v154_v20 = vld [vmem:[#allocation7 + $0x150] sm:$0xff]  ;;  %v155_v21 = vld [vmem:[#allocation7 + $0x158] sm:$0xff]  ;;  %178 = vmatpush.msra.mxu0 %v164_v15  ;;  %v157_v22 = vld [vmem:[#allocation7 + $0x168] sm:$0xff]  ;;  %s102_s4 = sshra.s32 %s101_s3, 3  ;;  %s105_s12 = sand.u32 7, %s101_s3 }
  0x21   : > { %219 = vmatpush.msra.mxu2 %v162_v11  ;;  %239 = vmatpush.msra.mxu3 %v163_v12  ;;  %v156_v23 = vld [vmem:[#allocation7 + $0x160] sm:$0xff]  ;;  %v150_v24 = vld [vmem:[#allocation7 + $0x130] sm:$0xff]  ;;  %v151_v25 = vld [vmem:[#allocation7 + $0x138] sm:$0xff]  ;;  %s449_s13 = sshll.u32 %s102_s4, 5  ;;  %s414_s8 = sshll.u32 (%p97_p0), %s775_s9, 4  ;;  %s415_s8 = int_to_ptr.hbm [resolvable:$true] %s414_s8 }
  0x22   : > { %199 = vmatpush.msra.mxu1 %v161_v18  ;;  %179 = vmatpush.msra.mxu0 %v160_v19  ;;  %v153_v26 = vld [vmem:[#allocation7 + $0x148] sm:$0xff]  ;;  %v152_v27 = vld [vmem:[#allocation7 + $0x140] sm:$0xff]  ;;  %v146_v28 = vld [vmem:[#allocation7 + $0x110] sm:$0xff]  ;;  %s108_s14 = sadd.s32 %s449_s13, %s105_s12  ;;  %s669_s1 = smov (%p97_p0), [#allocation13]  }
  0x23   : > { %220 = vmatpush.msra.mxu2 %v158_v16  ;;  %240 = vmatpush.msra.mxu3 %v159_v17  ;;  %v147_v29 = vld [vmem:[#allocation7 + $0x118] sm:$0xff]  ;;  %v149_v30 = vld [vmem:[#allocation7 + $0x128] sm:$0xff]  ;;  %v148_v31 = vld [vmem:[#allocation7 + $0x120] sm:$0xff]  ;;  %s109_s15 = scalar_lea.vmem [#allocation6], %s108_s14  ;;  %s412_s5 = sshll.u32 (%p97_p0), %s669_s1, 4  ;;  %s413_s5 = int_to_ptr.vmem [resolvable:$true] %s412_s5 }
  0x24   : > { %200 = vmatpush.msra.mxu1 %v157_v22  ;;  %180 = vmatpush.msra.mxu0 %v156_v23  ;;  %v142_v32 = vld [vmem:[#allocation7 + $0xf0] sm:$0xff]  ;;  %v143_v33 = vld [vmem:[#allocation7 + $0xf8] sm:$0xff]  ;;  %v145_v34 = vld [vmem:[#allocation7 + $0x108] sm:$0xff] }
  0x25   : > { %221 = vmatpush.msra.mxu2 %v154_v20  ;;  %241 = vmatpush.msra.mxu3 %v155_v21  ;;  %v144_v35 = vld [vmem:[#allocation7 + $0x100] sm:$0xff]  ;;  %v138_v36 = vld [vmem:[#allocation7 + $0xd0] sm:$0xff]  ;;  %v139_v37 = vld [vmem:[#allocation7 + $0xd8] sm:$0xff] }
  0x26   : > { %201 = vmatpush.msra.mxu1 %v153_v26  ;;  %181 = vmatpush.msra.mxu0 %v152_v27  ;;  %v141_v38 = vld [vmem:[#allocation7 + $0xe8] sm:$0xff]  ;;  %v140_v39 = vld [vmem:[#allocation7 + $0xe0] sm:$0xff]  ;;  %v134_v40 = vld [vmem:[#allocation7 + $0xb0] sm:$0xff] }
  0x27   : > { %222 = vmatpush.msra.mxu2 %v150_v24  ;;  %242 = vmatpush.msra.mxu3 %v151_v25  ;;  %v135_v41 = vld [vmem:[#allocation7 + $0xb8] sm:$0xff]  ;;  %v137_v42 = vld [vmem:[#allocation7 + $0xc8] sm:$0xff]  ;;  %v136_v43 = vld [vmem:[#allocation7 + $0xc0] sm:$0xff] }
  0x28   : > { %202 = vmatpush.msra.mxu1 %v149_v30  ;;  %182 = vmatpush.msra.mxu0 %v148_v31  ;;  %v130_v44 = vld [vmem:[#allocation7 + $0x90] sm:$0xff]  ;;  %v131_v45 = vld [vmem:[#allocation7 + $0x98] sm:$0xff]  ;;  %v133_v46 = vld [vmem:[#allocation7 + $0xa8] sm:$0xff] }
  0x29   : > { %223 = vmatpush.msra.mxu2 %v146_v28  ;;  %243 = vmatpush.msra.mxu3 %v147_v29  ;;  %v132_v47 = vld [vmem:[#allocation7 + $0xa0] sm:$0xff]  ;;  %v126_v48 = vld [vmem:[#allocation7 + $0x70] sm:$0xff]  ;;  %v127_v49 = vld [vmem:[#allocation7 + $0x78] sm:$0xff] }
  0x2a   : > { %203 = vmatpush.msra.mxu1 %v145_v34  ;;  %183 = vmatpush.msra.mxu0 %v144_v35  ;;  %v129_v50 = vld [vmem:[#allocation7 + $0x88] sm:$0xff]  ;;  %v128_v51 = vld [vmem:[#allocation7 + $0x80] sm:$0xff]  ;;  %v122_v52 = vld [vmem:[#allocation7 + $0x50] sm:$0xff] }
  0x2b   : > { %224 = vmatpush.msra.mxu2 %v142_v32  ;;  %244 = vmatpush.msra.mxu3 %v143_v33  ;;  %v123_v53 = vld [vmem:[#allocation7 + $0x58] sm:$0xff]  ;;  %v125_v54 = vld [vmem:[#allocation7 + $0x68] sm:$0xff]  ;;  %v124_v55 = vld [vmem:[#allocation7 + $0x60] sm:$0xff] }
  0x2c   : > { %204 = vmatpush.msra.mxu1 %v141_v38  ;;  %184 = vmatpush.msra.mxu0 %v140_v39  ;;  %v118_v56 = vld [vmem:[#allocation7 + $0x30] sm:$0xff]  ;;  %v119_v57 = vld [vmem:[#allocation7 + $0x38] sm:$0xff]  ;;  %v121_v58 = vld [vmem:[#allocation7 + $0x48] sm:$0xff] }
  0x2d   : > { %225 = vmatpush.msra.mxu2 %v138_v36  ;;  %245 = vmatpush.msra.mxu3 %v139_v37  ;;  %v120_v59 = vld [vmem:[#allocation7 + $0x40] sm:$0xff]  ;;  %v114_v60 = vld [vmem:[#allocation7 + $0x10] sm:$0xff]  ;;  %v115_v61 = vld [vmem:[#allocation7 + $0x18] sm:$0xff] }
  0x2e   : > { %205 = vmatpush.msra.mxu1 %v137_v42  ;;  %185 = vmatpush.msra.mxu0 %v136_v43  ;;  %v111_v62 = vld [vmem:[#allocation11] sm:$0x1]  ;;  %v117_v63 = vld [vmem:[#allocation7 + $0x28] sm:$0xff]  ;;  %v116_v0 = vld [vmem:[#allocation7 + $0x20] sm:$0xff] }
  0x2f   : > { %226 = vmatpush.msra.mxu2 %v134_v40  ;;  %246 = vmatpush.msra.mxu3 %v135_v41  ;;  %v113_v1 = vld [vmem:[#allocation7 + $0x8] sm:$0xff]  ;;  %v112_v2 = vld [vmem:[#allocation7] sm:$0xff]  ;;  %v357_v3 = vld [vmem:[#allocation9 + $0x78] sm:$0xff] }
  0x30   : > { %206 = vmatpush.msra.mxu1 %v133_v46  ;;  %186 = vmatpush.msra.mxu0 %v132_v47  ;;  %v356_v4 = vld [vmem:[#allocation9 + $0x70] sm:$0xff]  ;;  %v355_v5 = vld [vmem:[#allocation9 + $0x68] sm:$0xff]  ;;  %v354_v6 = vld [vmem:[#allocation9 + $0x60] sm:$0xff] }
  0x31   : > { %227 = vmatpush.msra.mxu2 %v130_v44  ;;  %247 = vmatpush.msra.mxu3 %v131_v45  ;;  %v353_v7 = vld [vmem:[#allocation9 + $0x58] sm:$0xff]  ;;  %v352_v8 = vld [vmem:[#allocation9 + $0x50] sm:$0xff]  ;;  %v351_v9 = vld [vmem:[#allocation9 + $0x48] sm:$0xff] }
  0x32   : > { %207 = vmatpush.msra.mxu1 %v129_v50  ;;  %187 = vmatpush.msra.mxu0 %v128_v51  ;;  %v350_v13 = vld [vmem:[#allocation9 + $0x40] sm:$0xff]  ;;  %v349_v19 = vld [vmem:[#allocation9 + $0x38] sm:$0xff]  ;;  %v348_v22 = vld [vmem:[#allocation9 + $0x30] sm:$0xff] }
  0x33   : > { %228 = vmatpush.msra.mxu2 %v126_v48  ;;  %248 = vmatpush.msra.mxu3 %v127_v49  ;;  %v110_v20 = vld [vmem:[%s109_s15] ss:$8 sm:$0xf] }
  0x34   : > { %208 = vmatpush.msra.mxu1 %v125_v54  ;;  %188 = vmatpush.msra.mxu0 %v124_v55  ;;  %v347_v25 = vld [vmem:[#allocation9 + $0x28] sm:$0xff]  ;;  %v346_v29 = vld [vmem:[#allocation9 + $0x20] sm:$0xff]  ;;  %v345_v32 = vld [vmem:[#allocation9 + $0x18] sm:$0xff] }
  0x35   : > { %229 = vmatpush.msra.mxu2 %v122_v52  ;;  %249 = vmatpush.msra.mxu3 %v123_v53  ;;  %v344_v33 = vld [vmem:[#allocation9 + $0x10] sm:$0xff]  ;;  %v343_v34 = vld [vmem:[#allocation9 + $0x8] sm:$0xff]  ;;  %v342_v36 = vld [vmem:[#allocation9] sm:$0xff] }
  0x36   : > { %209 = vmatpush.msra.mxu1 %v121_v58  ;;  %189 = vmatpush.msra.mxu0 %v120_v59 }
  0x37   : > { %230 = vmatpush.msra.mxu2 %v118_v56  ;;  %250 = vmatpush.msra.mxu3 %v119_v57 }
  0x38   : > { %210 = vmatpush.msra.mxu1 %v117_v63  ;;  %190 = vmatpush.msra.mxu0 %v116_v0  ;;  %v336_v0 = vld [vmem:[#allocation13] sm:$0x1] }
  0x39   : > { %231 = vmatpush.msra.mxu2 %v114_v60  ;;  %251 = vmatpush.msra.mxu3 %v115_v61 }
  0x3a   : > { %232 = vmatmul.f32.vlgmr.msra.gmra.mxu2 %v111_v62  ;;  %252 = vmatmul.f32.vlgmr.msra.gmra.mxu3 %v111_v62 }
  0x3b   : > { %211 = vmatpush.msra.mxu1 %v113_v1  ;;  %191 = vmatpush.msra.mxu0 %v112_v2 }
  0x3c   : > { %212 = vmatmul.f32.vlgmr.msra.gmra.mxu1 %v111_v62  ;;  %192 = vmatmul.f32.vlgmr.msra.gmra.mxu0 %v111_v62 }
  0x3d   : > { %359 = vmatpush.msrb.mxu0 %v357_v3 }
  0x3f   : > { %360 = vmatpush.msrb.mxu0 %v356_v4 }
  0x41   : > { %361 = vmatpush.msrb.mxu0 %v355_v5 }
  0x43   : > { %362 = vmatpush.msrb.mxu0 %v354_v6 }
  0x45   : > { %363 = vmatpush.msrb.mxu0 %v353_v7 }
  0x47   : > { %364 = vmatpush.msrb.mxu0 %v352_v8 }
  0x49   : > { %365 = vmatpush.msrb.mxu0 %v351_v9 }
  0x4b   : > { %366 = vmatpush.msrb.mxu0 %v350_v13 }
  0x4d   : > { %367 = vmatpush.msrb.mxu0 %v349_v19 }
  0x4f   : > { %368 = vmatpush.msrb.mxu0 %v348_v22 }
  0x51   : > { %369 = vmatpush.msrb.mxu0 %v347_v25 }
  0x53   : > { %370 = vmatpush.msrb.mxu0 %v346_v29 }
  0x55   : > { %371 = vmatpush.msrb.mxu0 %v345_v32 }
  0x57   : > { %372 = vmatpush.msrb.mxu0 %v344_v33 }
  0x59   : > { %373 = vmatpush.msrb.mxu0 %v343_v34 }
  0x5b   : > { %374 = vmatpush.msrb.mxu0 %v342_v36 }
  0xb9   : > { %v213_v10 = vpop.f32.mrf.mxu1  ;;  %v193_v11 = vpop.f32.mrf.mxu0 }
  0xba   : > { %v260_v12 = vrot.slane %v213_v10, 7 }
  0xbc   : > { %v264_v18 = vsel %vm263_vm0, %v193_v11, %v260_v12 }
  0xbd   : > { %v233_v14 = vpop.f32.mrf.mxu2  ;;  %v253_v15 = vpop.f32.mrf.mxu3 }
  0xbe   : > { %v261_v16 = vrot.slane %v233_v14, 6  ;;  %v262_v17 = vrot.slane %v253_v15, 5 }
  0xc0   : > { %v266_v21 = vsel %vm265_vm1, %v261_v16, %v262_v17  ;;  %v358_v16 = vld [vmem:[%s772_s6] sm:$0x1] }
  0xc1   : > { %v268_v23 = vsel %vm267_vm2, %v264_v18, %v266_v21 }
  0xc2   : > { %v270_v24 = vadd.f32 %v268_v23, %v110_v20 }
  0xc4   : > { %v446_v26 = vmul.f32 -1.442695, %v270_v24  ;;  %v291_v27 = vrot.slane %v270_v24, 1  ;;  %v315_v28 = vrot.slane %v270_v24, 3  ;;  %v312_v45 = vrot.slane %v270_v24, 2 }
  0xc6   : > { %469 = vpow2.f32 %v446_v26  ;;  %v447_v30 = vmul.f32 -1.442695, %v291_v27  ;;  %v448_v31 = vmul.f32 -1.442695, %v315_v28 }
  0xc8   : > { %471 = vpow2.f32 %v447_v30 }
  0xc9   : > { %473 = vpow2.f32 %v448_v31 }
  0xcc   : > { %v470_v35 = vpop.eup %469 }
  0xcd   : > { %v274_v37 = vadd.f32 1.0, %v470_v35 }
  0xce   : > { %v472_v38 = vpop.eup %471 }
  0xcf   : > { %v474_v39 = vpop.eup %473  ;;  %475 = vrcp.f32 %v274_v37  ;;  %v296_v40 = vadd.f32 1.0, %v472_v38  ;;  %v286_v49 = vand.u32 2147483648, %v274_v37  ;;  %v284_v52 = vand.u32 2147483647, %v274_v37 }
  0xd0   : > { %v320_v41 = vadd.f32 1.0, %v474_v39  ;;  %vm280_vm4 = vweird.f32 %v274_v37 }
  0xd1   : > { %477 = vrcp.f32 %v296_v40  ;;  %v308_v54 = vand.u32 2147483648, %v296_v40  ;;  %v306_v57 = vand.u32 2147483647, %v296_v40  ;;  %v287_v58 = vor.u32 1.1754944e-38, %v286_v49 }
  0xd2   : > { %479 = vrcp.f32 %v320_v41  ;;  %vm285_vm7 = vcmp.eq.f32.partialorder %v284_v52, 8.507059e+37  ;;  %vm302_vm8 = vweird.f32 %v296_v40  ;;  %v332_v9 = vand.u32 2147483648, %v320_v41 }
  0xd3   : > { %481 = vtanh.f32 %v312_v45  ;;  %v309_v63 = vor.u32 1.1754944e-38, %v308_v54  ;;  %vm307_vm10 = vcmp.eq.f32.partialorder %v306_v57, 8.507059e+37  ;;  %vm326_vm12 = vweird.f32 %v320_v41 }
  0xd4   : > { %v330_v10 = vand.u32 2147483647, %v320_v41  ;;  %v333_v12 = vor.u32 1.1754944e-38, %v332_v9 }
  0xd5   : > { %v476_v42 = vpop.eup %475 }
  0xd6   : > { %v276_v43 = vmul.f32 %v476_v42, %v274_v37  ;;  %vm281_vm3 = vweird.f32 %v476_v42  ;;  %vm331_vm14 = vcmp.eq.f32.partialorder %v330_v10, 8.507059e+37 }
  0xd7   : > { %v478_v44 = vpop.eup %477  ;;  %vm282_vm6 = vmor %vm280_vm4, %vm281_vm3 }
  0xd8   : > { %v480_v46 = vpop.eup %479  ;;  %v277_v47 = vsub.f32 1.0, %v276_v43  ;;  %v298_v48 = vmul.f32 %v478_v44, %v296_v40  ;;  %vm303_vm5 = vweird.f32 %v478_v44 }
  0xd9   : > { %v322_v50 = vmul.f32 %v480_v46, %v320_v41  ;;  %vm304_vm9 = vmor %vm302_vm8, %vm303_vm5  ;;  %v482_v2 = vpop.eup %481  ;;  %vm327_vm11 = vweird.f32 %v480_v46 }
  0xda   : > { %v278_v51 = vmul.f32 %v476_v42, %v277_v47  ;;  %v299_v53 = vsub.f32 1.0, %v298_v48  ;;  %vm328_vm13 = vmor %vm326_vm12, %vm327_vm11 }
  0xdb   : > { %v323_v59 = vsub.f32 1.0, %v322_v50 }
  0xdc   : > { %v279_v55 = vadd.f32 %v476_v42, %v278_v51  ;;  %v300_v56 = vmul.f32 %v478_v44, %v299_v53 }
  0xdd   : > { %v324_v4 = vmul.f32 %v480_v46, %v323_v59 }
  0xde   : > { %v283_v60 = vsel %vm282_vm6, %v476_v42, %v279_v55  ;;  %v301_v61 = vadd.f32 %v478_v44, %v300_v56 }
  0xdf   : > { %v288_v62 = vsel %vm285_vm7, %v287_v58, %v283_v60  ;;  %v325_v8 = vadd.f32 %v480_v46, %v324_v4 }
  0xe0   : > { %v305_v1 = vsel %vm304_vm9, %v478_v44, %v301_v61  ;;  %v338_v6 = vmul.f32 %v482_v2, %v288_v62 }
  0xe1   : > { %v310_v3 = vsel %vm307_vm10, %v309_v63, %v305_v1  ;;  %v329_v11 = vsel %vm328_vm13, %v480_v46, %v325_v8 }
  0xe2   : > { %v337_v5 = vmul.f32 %v336_v0, %v310_v3  ;;  %v334_v14 = vsel %vm331_vm14, %v333_v12, %v329_v11 }
  0xe4   : > { %v339_v7 = vadd.f32 %v338_v6, %v337_v5 }
  0xe6   : > { %483 = vtanh.f32 %v339_v7  ;;  %382 = vst [vmem:[#allocation13] sm:$0x1] %v339_v7 }
  0xec   : > { %v484_v13 = vpop.eup %483 }
  0xed   : > { %v341_v15 = vmul.f32 %v484_v13, %v334_v14 }
  0xef   : > { %375 = vmatmul.f32.vlgmr.msrb.gmra.mxu0 %v341_v15  ;;  %381 = vst [vmem:[#allocation11] sm:$0x1] %v341_v15 }
  0xf0   :  { %406 = dma.vmem_to_hbm [thread:$0]  (%p97_p0), %s402_s2, 16, %s404_s21, [#allocation12]  }
  0xf1   :  { %417 = dma.vmem_to_hbm [thread:$0]  (%p97_p0), %s413_s5, 16, %s415_s8, [#allocation12]  }
 0x16b   :  { %99 = sbr.rel (!%p97_p0) target bundleno = 26 (0x1a), region = 89 }
 0x16c   : > { %v376_v17 = vpop.f32.mrf.mxu0 }
 0x16d   : > { %v377_v18 = vadd.f32 %v376_v17, %v358_v16 }
 0x16f   : > { %380 = vst [vmem:[%s379_s18] sm:$0x1] %v377_v18 }
 0x170   :  { %395 = dma.vmem_to_hbm [thread:$0]  %s388_s24, 256, %s390_s0, [#allocation4], %s665_s28, %s665_s28, %s666_s29  }
 0x171   :  { %651 = dma.done.wait [#allocation4], 256  }
 0x172   :  { %652 = vsyncadd [#allocation4], 4294967040 }
 0x173   :  { %653 = dma.done.wait [#allocation12], 32  }
 0x174   :  { %654 = vsyncadd [#allocation12], 4294967264 }
 0x175   :  { %430 = vsyncpa [#allocation3], 1 }
 0x176   :  { %431 = vsyncpa [#allocation8], 1 }
 0x177   :  { %432 = vsyncpa [#allocation4], 1 }
 0x178   :  { %433 = vsyncpa [#allocation12], 1 }
 0x179   :  { %434 = vsyncpa [#allocation5], 1 }

</bundles_post_ra>
